<compile_context>
chip_gen: v5e
topology: v5e:2x2
jax: 0.10.0
libtpu: 0.0.40
codegen_flags: <defaults>
</compile_context>

<pallas_src>
import jax
import jax.numpy as jnp
from jax.experimental import pallas as pl
from jax.experimental.pallas import tpu as pltpu

IN_DIM = 101
HID = 40
NUM_BLOCKS = 7  # hidden MlpBlocks after the first layer


def _cdiv(a, b):
    return -(-a // b)


def _round_up(n, m):
    return ((n + m - 1) // m) * m


def _choose_tiling(batch, tb_cap):
    """Pick (tile_rows, num_tiles, padded_batch).

    Invariants:
      * tile_rows is a multiple of 8 (BlockSpec sublane constraint),
      * num_tiles is even and >= 2 (both v7x TensorCores get work; DMA and
        compute can pipeline),
      * tile_rows <= round_up(tb_cap, 8) and tile_rows * num_tiles >= batch.
    """
    tb_cap = max(8, _round_up(int(tb_cap), 8))
    b8 = _round_up(max(int(batch), 8), 8)
    n = max(2, _cdiv(b8, tb_cap))
    n += n % 2                       # even number of grid steps
    tb = _round_up(_cdiv(b8, n), 8)  # multiple of 8, <= tb_cap
    b_pad = tb * n
    return tb, n, b_pad


def branchnet_kernel(x_ref, w0_ref, b0_ref, ws_ref, bs_ref, out_ref):
    # x_ref:  (TB, 101) f32 (or bf16)
    # w0_ref: (101, 40) bf16      b0_ref: (1, 40)  f32
    # ws_ref: (7, 40, 40) bf16    bs_ref: (7, 1, 40) f32
    # out_ref: (TB, 40) f32
    x = x_ref[...].astype(jnp.bfloat16)

    # Hoist bias loads once per tile (JAX does not CSE broadcast_in_dim).
    b0 = b0_ref[...]        # (1, 40)    f32
    b_all = bs_ref[...]     # (7, 1, 40) f32

    # first_layers: Linear(101 -> 40) + Tanh.  bf16 MXU inputs, f32 accumulate.
    h = jnp.tanh(
        jnp.dot(x, w0_ref[...], preferred_element_type=jnp.float32) + b0
    )

    # branch_layers: 7 x (Linear(40 -> 40) + Tanh), statically unrolled.
    for i in range(NUM_BLOCKS):
        h = jnp.tanh(
            jnp.dot(h.astype(jnp.bfloat16), ws_ref[i],
                    preferred_element_type=jnp.float32)
            + b_all[i]
        )

    out_ref[...] = h.astype(out_ref.dtype)


def branchnet_forward(x, w0, b0, ws, bs, *, tb=2048):
    """x: (B, 101). w0: (101, 40). b0: (40,). ws: (7, 40, 40). bs: (7, 40)."""
    B = x.shape[0]
    assert x.shape == (B, IN_DIM)

    tile_rows, grid_n, B_pad = _choose_tiling(B, tb)
    if B_pad != B:
        # Padded rows run through all 8 layers (they become tanh(bias) chains,
        # not zeros) and are sliced off below; compute waste is bounded by
        # tile_rows - 1 rows.
        x = jnp.pad(x, ((0, B_pad - B), (0, 0)))

    # Cast MXU operands to bf16 once, outside the kernel; biases stay f32.
    w0_bf16 = w0.astype(jnp.bfloat16)
    ws_bf16 = ws.astype(jnp.bfloat16)
    b0_2d = b0.reshape(1, HID).astype(jnp.float32)
    bs_3d = bs.reshape(NUM_BLOCKS, 1, HID).astype(jnp.float32)

    out = pl.pallas_call(
        branchnet_kernel,
        out_shape=jax.ShapeDtypeStruct((B_pad, HID), jnp.float32),
        grid_spec=pltpu.PrefetchScalarGridSpec(
            num_scalar_prefetch=0,
            grid=(grid_n,),
            in_specs=[
                # x tile moves with the grid index.
                pl.BlockSpec((tile_rows, IN_DIM), lambda i: (i, 0)),
                # Weights/biases: constant index maps -> VMEM-resident.
                pl.BlockSpec((IN_DIM, HID), lambda i: (0, 0)),
                pl.BlockSpec((1, HID), lambda i: (0, 0)),
                pl.BlockSpec((NUM_BLOCKS, HID, HID), lambda i: (0, 0, 0)),
                pl.BlockSpec((NUM_BLOCKS, 1, HID), lambda i: (0, 0, 0)),
            ],
            out_specs=pl.BlockSpec((tile_rows, HID), lambda i: (i, 0)),
        ),
        compiler_params=pltpu.CompilerParams(
            # Batch tiles are independent -> shard across TensorCores (v7x).
            dimension_semantics=("parallel",),
        ),
    )(x, w0_bf16, b0_2d, ws_bf16, bs_3d)

    return out[:B] if B_pad != B else out


def init_params(key):
    """Deterministic init mimicking PyTorch nn.Linear default (U[-1/sqrt(fan_in), +])."""
    k0, k1, k2, k3 = jax.random.split(key, 4)
    bound0 = 1.0 / jnp.sqrt(float(IN_DIM))
    # Weights stored already transposed: (in_features, out_features).
    w0 = jax.random.uniform(k0, (IN_DIM, HID), jnp.float32, -bound0, bound0)
    b0 = jax.random.uniform(k1, (HID,), jnp.float32, -bound0, bound0)

    bound = 1.0 / jnp.sqrt(float(HID))
    ws = jax.random.uniform(k2, (NUM_BLOCKS, HID, HID), jnp.float32, -bound, bound)
    bs = jax.random.uniform(k3, (NUM_BLOCKS, HID), jnp.float32, -bound, bound)
    return w0, b0, ws, bs


def reference_forward(x, w0, b0, ws, bs, *, mixed_precision=False):
    """Pure-JAX reference. mixed_precision=True mirrors the kernel's bf16 MXU inputs."""
    cast = (lambda a: a.astype(jnp.bfloat16)) if mixed_precision else (lambda a: a)
    h = jnp.tanh(
        jnp.dot(cast(x), cast(w0), preferred_element_type=jnp.float32) + b0
    )
    for i in range(NUM_BLOCKS):
        h = jnp.tanh(
            jnp.dot(cast(h), cast(ws[i]), preferred_element_type=jnp.float32) + bs[i]
        )
    return h


if __name__ == "__main__":
    key = jax.random.PRNGKey(0)
    kx, kp = jax.random.split(key)
    w0, b0, ws, bs = init_params(kp)

    # Tiny batch: padded 8 -> 16 rows, grid = (2,) (both TensorCores usable).
    B = 8
    x = jax.random.normal(kx, (B, IN_DIM), jnp.float32)
    out = jax.block_until_ready(branchnet_forward(x, w0, b0, ws, bs))
    assert out.shape == (B, HID)

    ref_mixed = reference_forward(x, w0, b0, ws, bs, mixed_precision=True)
    assert jnp.allclose(out, ref_mixed, atol=1e-5, rtol=1e-5), "mismatch vs mixed ref"
    ref_f32 = reference_forward(x, w0, b0, ws, bs, mixed_precision=False)
    assert float(jnp.max(jnp.abs(out - ref_f32))) < 1e-1, "mismatch vs f32 ref"

    # Multi-step grid: B=300 with cap 64 -> tile 56, grid = (6,) (odd->even
    # rounding + remainder padding exercised).
    B2 = 300
    x2 = jax.random.normal(jax.random.fold_in(kx, 1), (B2, IN_DIM), jnp.float32)
    out2 = jax.block_until_ready(branchnet_forward(x2, w0, b0, ws, bs, tb=64))
    assert out2.shape == (B2, HID)
    ref2 = reference_forward(x2, w0, b0, ws, bs, mixed_precision=True)
    assert jnp.allclose(out2, ref2, atol=1e-5, rtol=1e-5), "mismatch vs mixed ref (tiled)"

    # Non-multiple-of-8 caller tile size is now rounded up instead of failing
    # the (8,128) lowering constraint.
    out3 = jax.block_until_ready(branchnet_forward(x2, w0, b0, ws, bs, tb=100))
    assert out3.shape == (B2, HID)
    assert jnp.allclose(out3, ref2, atol=1e-5, rtol=1e-5), "mismatch vs mixed ref (tb=100)"

    print("KERNEL_OK")
</pallas_src>

<mosaic_0001>
module attributes {stable_mosaic.version = 11 : i64} {
  func.func @branchnet_kernel(%arg0: i32, %arg1: memref<8x101xf32, #tpu.memory_space<vmem>>, %arg2: memref<101x40xbf16, #tpu.memory_space<vmem>>, %arg3: memref<1x40xf32, #tpu.memory_space<vmem>>, %arg4: memref<7x40x40xbf16, #tpu.memory_space<vmem>>, %arg5: memref<7x1x40xf32, #tpu.memory_space<vmem>>, %arg6: memref<8x40xf32, #tpu.memory_space<vmem>>) attributes {dimension_semantics = [#tpu.dimension_semantics<parallel>], iteration_bounds = array<i64: 2>, scalar_prefetch = 0 : i64, scratch_operands = 0 : i64, tpu.core_type = #tpu.core_type<tc>, window_params = [{transform_indices = @transform_0, window_bounds = array<i64: 8, 101>}, {pipeline_mode = #tpu.pipeline_mode<synchronous>, transform_indices = @transform_1, window_bounds = array<i64: 101, 40>}, {pipeline_mode = #tpu.pipeline_mode<synchronous>, transform_indices = @transform_2, window_bounds = array<i64: 1, 40>}, {pipeline_mode = #tpu.pipeline_mode<synchronous>, transform_indices = @transform_3, window_bounds = array<i64: 7, 40, 40>}, {pipeline_mode = #tpu.pipeline_mode<synchronous>, transform_indices = @transform_4, window_bounds = array<i64: 7, 1, 40>}, {transform_indices = @transform_5, window_bounds = array<i64: 8, 40>}]} {
    %c0 = arith.constant 0 : index
    %c0_0 = arith.constant 0 : index
    %0 = vector.load %arg1[%c0, %c0_0] : memref<8x101xf32, #tpu.memory_space<vmem>>, vector<8x101xf32>
    %1 = arith.truncf %0 : vector<8x101xf32> to vector<8x101xbf16>
    %c0_1 = arith.constant 0 : index
    %c0_2 = arith.constant 0 : index
    %2 = vector.load %arg3[%c0_1, %c0_2] : memref<1x40xf32, #tpu.memory_space<vmem>>, vector<1x40xf32>
    %c0_3 = arith.constant 0 : index
    %c0_4 = arith.constant 0 : index
    %c0_5 = arith.constant 0 : index
    %3 = vector.load %arg5[%c0_3, %c0_4, %c0_5] : memref<7x1x40xf32, #tpu.memory_space<vmem>>, vector<7x1x40xf32>
    %c0_6 = arith.constant 0 : index
    %c0_7 = arith.constant 0 : index
    %4 = vector.load %arg2[%c0_6, %c0_7] : memref<101x40xbf16, #tpu.memory_space<vmem>>, vector<101x40xbf16>
    %cst = arith.constant dense<0.000000e+00> : vector<8x40xf32>
    %5 = tpu.matmul %1, %4, %cst {dimension_numbers = #tpu.dot_dimension_numbers<[1], [0], [0], [1], [0, 0, 1, 1], [], []>} : vector<8x101xbf16>, vector<101x40xbf16>, vector<8x40xf32> -> vector<8x40xf32>
    %6 = vector.broadcast %2 : vector<1x40xf32> to vector<8x40xf32>
    %7 = arith.addf %5, %6 : vector<8x40xf32>
    %8 = math.tanh %7 : vector<8x40xf32>
    %9 = arith.truncf %8 : vector<8x40xf32> to vector<8x40xbf16>
    %c0_8 = arith.constant 0 : index
    %c0_9 = arith.constant 0 : index
    %c0_10 = arith.constant 0 : index
    %10 = vector.load %arg4[%c0_8, %c0_9, %c0_10] : memref<7x40x40xbf16, #tpu.memory_space<vmem>>, vector<1x40x40xbf16>
    %11 = vector.shape_cast %10 : vector<1x40x40xbf16> to vector<40x40xbf16>
    %cst_11 = arith.constant dense<0.000000e+00> : vector<8x40xf32>
    %12 = tpu.matmul %9, %11, %cst_11 {dimension_numbers = #tpu.dot_dimension_numbers<[1], [0], [0], [1], [0, 0, 1, 1], [], []>} : vector<8x40xbf16>, vector<40x40xbf16>, vector<8x40xf32> -> vector<8x40xf32>
    %13 = vector.extract_strided_slice %3 {offsets = [0, 0, 0], sizes = [1, 1, 40], strides = [1, 1, 1]} : vector<7x1x40xf32> to vector<1x1x40xf32>
    %14 = vector.shape_cast %13 : vector<1x1x40xf32> to vector<1x40xf32>
    %15 = vector.broadcast %14 : vector<1x40xf32> to vector<8x40xf32>
    %16 = arith.addf %12, %15 : vector<8x40xf32>
    %17 = math.tanh %16 : vector<8x40xf32>
    %18 = arith.truncf %17 : vector<8x40xf32> to vector<8x40xbf16>
    %c1 = arith.constant 1 : index
    %c0_12 = arith.constant 0 : index
    %c0_13 = arith.constant 0 : index
    %19 = vector.load %arg4[%c1, %c0_12, %c0_13] : memref<7x40x40xbf16, #tpu.memory_space<vmem>>, vector<1x40x40xbf16>
    %20 = vector.shape_cast %19 : vector<1x40x40xbf16> to vector<40x40xbf16>
    %cst_14 = arith.constant dense<0.000000e+00> : vector<8x40xf32>
    %21 = tpu.matmul %18, %20, %cst_14 {dimension_numbers = #tpu.dot_dimension_numbers<[1], [0], [0], [1], [0, 0, 1, 1], [], []>} : vector<8x40xbf16>, vector<40x40xbf16>, vector<8x40xf32> -> vector<8x40xf32>
    %22 = vector.extract_strided_slice %3 {offsets = [1, 0, 0], sizes = [1, 1, 40], strides = [1, 1, 1]} : vector<7x1x40xf32> to vector<1x1x40xf32>
    %23 = vector.shape_cast %22 : vector<1x1x40xf32> to vector<1x40xf32>
    %24 = vector.broadcast %23 : vector<1x40xf32> to vector<8x40xf32>
    %25 = arith.addf %21, %24 : vector<8x40xf32>
    %26 = math.tanh %25 : vector<8x40xf32>
    %27 = arith.truncf %26 : vector<8x40xf32> to vector<8x40xbf16>
    %c2 = arith.constant 2 : index
    %c0_15 = arith.constant 0 : index
    %c0_16 = arith.constant 0 : index
    %28 = vector.load %arg4[%c2, %c0_15, %c0_16] : memref<7x40x40xbf16, #tpu.memory_space<vmem>>, vector<1x40x40xbf16>
    %29 = vector.shape_cast %28 : vector<1x40x40xbf16> to vector<40x40xbf16>
    %cst_17 = arith.constant dense<0.000000e+00> : vector<8x40xf32>
    %30 = tpu.matmul %27, %29, %cst_17 {dimension_numbers = #tpu.dot_dimension_numbers<[1], [0], [0], [1], [0, 0, 1, 1], [], []>} : vector<8x40xbf16>, vector<40x40xbf16>, vector<8x40xf32> -> vector<8x40xf32>
    %31 = vector.extract_strided_slice %3 {offsets = [2, 0, 0], sizes = [1, 1, 40], strides = [1, 1, 1]} : vector<7x1x40xf32> to vector<1x1x40xf32>
    %32 = vector.shape_cast %31 : vector<1x1x40xf32> to vector<1x40xf32>
    %33 = vector.broadcast %32 : vector<1x40xf32> to vector<8x40xf32>
    %34 = arith.addf %30, %33 : vector<8x40xf32>
    %35 = math.tanh %34 : vector<8x40xf32>
    %36 = arith.truncf %35 : vector<8x40xf32> to vector<8x40xbf16>
    %c3 = arith.constant 3 : index
    %c0_18 = arith.constant 0 : index
    %c0_19 = arith.constant 0 : index
    %37 = vector.load %arg4[%c3, %c0_18, %c0_19] : memref<7x40x40xbf16, #tpu.memory_space<vmem>>, vector<1x40x40xbf16>
    %38 = vector.shape_cast %37 : vector<1x40x40xbf16> to vector<40x40xbf16>
    %cst_20 = arith.constant dense<0.000000e+00> : vector<8x40xf32>
    %39 = tpu.matmul %36, %38, %cst_20 {dimension_numbers = #tpu.dot_dimension_numbers<[1], [0], [0], [1], [0, 0, 1, 1], [], []>} : vector<8x40xbf16>, vector<40x40xbf16>, vector<8x40xf32> -> vector<8x40xf32>
    %40 = vector.extract_strided_slice %3 {offsets = [3, 0, 0], sizes = [1, 1, 40], strides = [1, 1, 1]} : vector<7x1x40xf32> to vector<1x1x40xf32>
    %41 = vector.shape_cast %40 : vector<1x1x40xf32> to vector<1x40xf32>
    %42 = vector.broadcast %41 : vector<1x40xf32> to vector<8x40xf32>
    %43 = arith.addf %39, %42 : vector<8x40xf32>
    %44 = math.tanh %43 : vector<8x40xf32>
    %45 = arith.truncf %44 : vector<8x40xf32> to vector<8x40xbf16>
    %c4 = arith.constant 4 : index
    %c0_21 = arith.constant 0 : index
    %c0_22 = arith.constant 0 : index
    %46 = vector.load %arg4[%c4, %c0_21, %c0_22] : memref<7x40x40xbf16, #tpu.memory_space<vmem>>, vector<1x40x40xbf16>
    %47 = vector.shape_cast %46 : vector<1x40x40xbf16> to vector<40x40xbf16>
    %cst_23 = arith.constant dense<0.000000e+00> : vector<8x40xf32>
    %48 = tpu.matmul %45, %47, %cst_23 {dimension_numbers = #tpu.dot_dimension_numbers<[1], [0], [0], [1], [0, 0, 1, 1], [], []>} : vector<8x40xbf16>, vector<40x40xbf16>, vector<8x40xf32> -> vector<8x40xf32>
    %49 = vector.extract_strided_slice %3 {offsets = [4, 0, 0], sizes = [1, 1, 40], strides = [1, 1, 1]} : vector<7x1x40xf32> to vector<1x1x40xf32>
    %50 = vector.shape_cast %49 : vector<1x1x40xf32> to vector<1x40xf32>
    %51 = vector.broadcast %50 : vector<1x40xf32> to vector<8x40xf32>
    %52 = arith.addf %48, %51 : vector<8x40xf32>
    %53 = math.tanh %52 : vector<8x40xf32>
    %54 = arith.truncf %53 : vector<8x40xf32> to vector<8x40xbf16>
    %c5 = arith.constant 5 : index
    %c0_24 = arith.constant 0 : index
    %c0_25 = arith.constant 0 : index
    %55 = vector.load %arg4[%c5, %c0_24, %c0_25] : memref<7x40x40xbf16, #tpu.memory_space<vmem>>, vector<1x40x40xbf16>
    %56 = vector.shape_cast %55 : vector<1x40x40xbf16> to vector<40x40xbf16>
    %cst_26 = arith.constant dense<0.000000e+00> : vector<8x40xf32>
    %57 = tpu.matmul %54, %56, %cst_26 {dimension_numbers = #tpu.dot_dimension_numbers<[1], [0], [0], [1], [0, 0, 1, 1], [], []>} : vector<8x40xbf16>, vector<40x40xbf16>, vector<8x40xf32> -> vector<8x40xf32>
    %58 = vector.extract_strided_slice %3 {offsets = [5, 0, 0], sizes = [1, 1, 40], strides = [1, 1, 1]} : vector<7x1x40xf32> to vector<1x1x40xf32>
    %59 = vector.shape_cast %58 : vector<1x1x40xf32> to vector<1x40xf32>
    %60 = vector.broadcast %59 : vector<1x40xf32> to vector<8x40xf32>
    %61 = arith.addf %57, %60 : vector<8x40xf32>
    %62 = math.tanh %61 : vector<8x40xf32>
    %63 = arith.truncf %62 : vector<8x40xf32> to vector<8x40xbf16>
    %c6 = arith.constant 6 : index
    %c0_27 = arith.constant 0 : index
    %c0_28 = arith.constant 0 : index
    %64 = vector.load %arg4[%c6, %c0_27, %c0_28] : memref<7x40x40xbf16, #tpu.memory_space<vmem>>, vector<1x40x40xbf16>
    %65 = vector.shape_cast %64 : vector<1x40x40xbf16> to vector<40x40xbf16>
    %cst_29 = arith.constant dense<0.000000e+00> : vector<8x40xf32>
    %66 = tpu.matmul %63, %65, %cst_29 {dimension_numbers = #tpu.dot_dimension_numbers<[1], [0], [0], [1], [0, 0, 1, 1], [], []>} : vector<8x40xbf16>, vector<40x40xbf16>, vector<8x40xf32> -> vector<8x40xf32>
    %67 = vector.extract_strided_slice %3 {offsets = [6, 0, 0], sizes = [1, 1, 40], strides = [1, 1, 1]} : vector<7x1x40xf32> to vector<1x1x40xf32>
    %68 = vector.shape_cast %67 : vector<1x1x40xf32> to vector<1x40xf32>
    %69 = vector.broadcast %68 : vector<1x40xf32> to vector<8x40xf32>
    %70 = arith.addf %66, %69 : vector<8x40xf32>
    %71 = math.tanh %70 : vector<8x40xf32>
    %c0_30 = arith.constant 0 : index
    %c0_31 = arith.constant 0 : index
    %72 = vector.load %arg6[%c0_30, %c0_31] : memref<8x40xf32, #tpu.memory_space<vmem>>, vector<8x40xf32>
    tpu.vector_store %arg6[%c0_30, %c0_31], %71 {strides = array<i32>} : memref<8x40xf32, #tpu.memory_space<vmem>>, vector<8x40xf32>,
    return
  }
  func.func @transform_0(%arg0: i32) -> (i32, i32) {
    %c0_i32 = arith.constant 0 : i32
    %c0_i32_0 = arith.constant 0 : i32
    return %arg0, %c0_i32 : i32, i32
  }
  func.func @transform_1(%arg0: i32) -> (i32, i32) {
    %c0_i32 = arith.constant 0 : i32
    %c0_i32_0 = arith.constant 0 : i32
    %c0_i32_1 = arith.constant 0 : i32
    return %c0_i32, %c0_i32_0 : i32, i32
  }
  func.func @transform_2(%arg0: i32) -> (i32, i32) {
    %c0_i32 = arith.constant 0 : i32
    %c0_i32_0 = arith.constant 0 : i32
    %c0_i32_1 = arith.constant 0 : i32
    return %c0_i32, %c0_i32_0 : i32, i32
  }
  func.func @transform_3(%arg0: i32) -> (i32, i32, i32) {
    %c0_i32 = arith.constant 0 : i32
    %c0_i32_0 = arith.constant 0 : i32
    %c0_i32_1 = arith.constant 0 : i32
    %c0_i32_2 = arith.constant 0 : i32
    return %c0_i32, %c0_i32_0, %c0_i32_1 : i32, i32, i32
  }
  func.func @transform_4(%arg0: i32) -> (i32, i32, i32) {
    %c0_i32 = arith.constant 0 : i32
    %c0_i32_0 = arith.constant 0 : i32
    %c0_i32_1 = arith.constant 0 : i32
    %c0_i32_2 = arith.constant 0 : i32
    return %c0_i32, %c0_i32_0, %c0_i32_1 : i32, i32, i32
  }
  func.func @transform_5(%arg0: i32) -> (i32, i32) {
    %c0_i32 = arith.constant 0 : i32
    %c0_i32_0 = arith.constant 0 : i32
    return %arg0, %c0_i32 : i32, i32
  }
}

</mosaic_0001>

<bundles_post_ra>
// kernel: tpu_custom_call.1
= control target key start
LH: loop header
LB: loop body
LE: loop exit
PB: predicated region body
PF: predicated region fallthrough
CT: control target
= control target key end

     0   :  { %10 = vsyncpa [#allocation3], 0  ;;  %s1216_s0 = inlined_call_operand.vmem [shape: f32[16,101], index: 0, kind: input, shape index: {}]   ;;  %s1217_s1 = inlined_call_operand.vmem [shape: bf16[101,40], index: 1, kind: input, shape index: {}]   ;;  %s1218_s2 = inlined_call_operand.vmem [shape: f32[1,40], index: 2, kind: input, shape index: {}]   ;;  %s1219_s3 = inlined_call_operand.hbm [shape: bf16[7,40,40], index: 3, kind: input, shape index: {}]   ;;  %s1220_s4 = inlined_call_operand.vmem [shape: f32[7,1,40], index: 4, kind: input, shape index: {}]   ;;  %s1221_s5 = inlined_call_operand.hbm [shape: f32[16,40], index: 5, kind: output, shape index: {}]  }
   0x1   :  { %11 = vsyncpa [#allocation4], 0 }
   0x2   :  { %13 = vsyncpa [#allocation4 + $0x1], 0  ;;  %s1061_s18 = smov 0   ;;  %s1063_s19 = smov 0  }
   0x3   :  { %s1065_s20 = smov 0   ;;  %s1067_s21 = smov 0  }
   0x4 LB: > { %s1082_s22 = sadd.s32 4294967295, %s1025_s21   ;;  %s732_s23 = sadd.s32 4294967294, %s1025_s21   ;;  %s1025_s21 = sphi %s1067_s21, %s1227_s21   ;;  %s1021_s20 = sphi %s1065_s20, %s1226_s20   ;;  %s1017_s19 = sphi %s1063_s19, %s1225_s19   ;;  %s1013_s18 = sphi %s1061_s18, %s1224_s18  }
   0x5   : > { %s1086_s24 = sadd.s32 1, %s1025_s21   ;;  %s136_s25 = sadd.s32 1, %s1021_s20 }
   0x6   : > { %s133_s26 = ssub.s32 %s1025_s21, %s1086_s24  ;;  %p146_p0 = scmp.ne.s32.totalorder %s1021_s20, %s1017_s19 }
   0x7   : > { %p134_p1 = scmp.eq.s32.totalorder %s133_s26, 0  ;;  %p147_p2 = scmp.eq.s32.totalorder %s1082_s22, 1 }
   0x8   : > { %p152_p3 = scmp.ne.s32.totalorder %s1017_s19, %s1013_s18  ;;  %p153_p4 = scmp.eq.s32.totalorder %s732_s23, 1 }
   0x9   : > { %s1097_s27 = scalar_select %p134_p1, %s1021_s20, %s136_s25  }
   0xa   : > { %p1099_p5 = por %p147_p2, %p146_p0  ;;  %p1103_p6 = por %p153_p4, %p152_p3 }
   0xb   : > { %p733_p7 = scmp.ge.s32.totalorder %s1025_s21, 1  ;;  %p160_p8 = scmp.lt.s32.totalorder %s1025_s21, 3 }
   0xc   : > { %p866_p9 = scmp.eq.s32.totalorder %s1082_s22, 0  ;;  %s177_s7 = sshll.u32 %s1219_s3, 4  ;;  %s178_s7 = int_to_ptr.hbm [resolvable:$true] %s177_s7 }
   0xd   : > { %p161_p10 = pnand %p733_p7, %p160_p8  ;;  %s1027_s8 = smov [#allocation2]  }
   0xe   : > { %s179_s9 = sshll.u32 %s1027_s8, 4  ;;  %s1028_s10 = smov 64   ;;  %s180_s9 = int_to_ptr.vmem [resolvable:$true] %s179_s9 }
   0xf   : > { %p858_p11 = pneg %p161_p10  ;;  %s1029_s11 = smov 4  }
  0x10   : > { %205 = sbr.rel (%p161_p10) target bundleno = 1178 (0x49a), region = 40 }
  0x11   : > { %p859_p12 = pnand %p866_p9, %p858_p11 }
  0x13   : > { %861 = dma.hbm_to_vmem [thread:$0]  (!%p859_p12), %s178_s7, 2240, %s180_s9, [#allocation3], %s1028_s10, %s1028_s10, %s1029_s11  }
  0x15   : > { %1004 = dma.done.wait (%p866_p9), [#allocation3], 2240  }
  0x16   : > { %1006 = vsyncadd (%p866_p9), [#allocation3], 4294965056  ;;  %vm307_vm0 = vcmask 1041408   ;;  %vm308_vm1 = vcmask 1042432   ;;  %v1030_v0 = vmov 65535   ;;  %v837_v7 = vld [vmem:[%s1217_s1 + $0x28] sm:$0xff] }
  0x17   : > { %v309_v1 = vsel %vm307_vm0, 4294967295, %v1030_v0  ;;  %v260_v2 = vld [vmem:[%s1217_s1 + $0x30] sm:$0x7]  ;;  %v836_v8 = vld [vmem:[%s1217_s1 + $0x20] sm:$0xff]  ;;  %p233_p13 = scmp.lt.s32.totalorder %s1082_s22, 1  ;;  %v835_v9 = vld [vmem:[%s1217_s1 + $0x18] sm:$0xff] }
  0x18   : > { %v289_v3 = vunpack.c.l.b16 %v260_v2  ;;  %v310_v4 = vsel %vm308_vm1, %v309_v1, 0  ;;  %v834_v10 = vld [vmem:[%s1217_s1 + $0x10] sm:$0xff]  ;;  %v833_v11 = vld [vmem:[%s1217_s1 + $0x8] sm:$0xff]  ;;  %v832_v12 = vld [vmem:[%s1217_s1] sm:$0xff]  ;;  %vm303_vm2 = vcmask 826368   ;;  %vm356_vm3 = vcmask 1043456  }
  0x19   : > { %s234_s26 = scalar_select %p233_p13, %s1082_s22, 1  ;;  %v333_v15 = vld [vmem:[#allocation2 + $0x10] sm:$0xf]  ;;  %v839_v19 = vld [vmem:[#allocation2 + $0x8] sm:$0xff]  ;;  %v838_v20 = vld [vmem:[#allocation2] sm:$0xff]  ;;  %vm352_vm4 = vcmask 326656  }
  0x1a   : > { %v296_v5 = vpack.c.b16 %v289_v3, %v289_v3  ;;  %v346_v16 = vunpack.c.l.b16 %v333_v15  ;;  %v905_v21 = vld [vmem:[%s1218_s2] ss:$0 sm:$0xff]  ;;  %v380_v27 = vld [vmem:[#allocation2 + $0x24] sm:$0xf]  ;;  %v840_v32 = vld [vmem:[#allocation2 + $0x14] sm:$0xff]  ;;  %s230_s13 = sand.u32 1, %s1017_s19  }
  0x1b   : > { %s739_s7 = sshll.u32 %s234_s26, 3  ;;  %v393_v28 = vunpack.c.l.b16 %v380_v27  ;;  %v841_v31 = vld [vmem:[#allocation2 + $0x1c] sm:$0xff]  ;;  %v425_v39 = vld [vmem:[#allocation2 + $0x38] sm:$0xf]  ;;  %v843_v43 = vld [vmem:[#allocation2 + $0x30] sm:$0xff]  ;;  %s738_s16 = sshll.u32 %s230_s13, 3 }
  0x1c   : > { %v312_v6 = vand.u32 %v310_v4, %v296_v5  ;;  %s236_s12 = scalar_lea.vmem %s1216_s0, %s739_s7  ;;  %v349_v17 = vpack.c.b16 %v346_v16, %v346_v16  ;;  %v906_v33 = vld [vmem:[%s1220_s4] ss:$0 sm:$0xff]  ;;  %v438_v40 = vunpack.c.l.b16 %v425_v39  ;;  %v842_v44 = vld [vmem:[#allocation2 + $0x28] sm:$0xff]  ;;  %v907_v49 = vld [vmem:[%s1220_s4 + $0x1] ss:$0 sm:$0xff]  ;;  %s829_s17 = sshll.u32 %s1082_s22, 3 }
  0x1d   : > { %v238_v13 = vld [vmem:[%s236_s12] sm:$0xff]  ;;  %v396_v29 = vpack.c.b16 %v393_v28, %v393_v28  ;;  %v470_v45 = vld [vmem:[#allocation2 + $0x4c] sm:$0xf]  ;;  %v847_v3 = vld [vmem:[#allocation2 + $0x58] sm:$0xff]  ;;  %s656_s26 = scalar_lea.hbm %s1221_s5, %s829_s17  ;;  %s232_s30 = scalar_lea.vmem [#allocation5], %s738_s16 }
  0x1e   : > { %315 = vmatpush.bf16.msra.mxu0 %v312_v6  ;;  %v239_v14 = vpack.c.bf16 %v238_v13, %v238_v13  ;;  %v358_v18 = vsel %vm356_vm3, %v349_v17, 0  ;;  %v441_v41 = vpack.c.b16 %v438_v40, %v438_v40  ;;  %v483_v46 = vunpack.c.l.b16 %v470_v45  ;;  %v845_v55 = vld [vmem:[#allocation2 + $0x44] sm:$0xff]  ;;  %v844_v56 = vld [vmem:[#allocation2 + $0x3c] sm:$0xff]  ;;  %v846_v4 = vld [vmem:[#allocation2 + $0x50] sm:$0xff]  ;;  %s658_s6 = sshll.u32 %s232_s30, 4  ;;  %s660_s7 = sshll.u32 %s656_s26, 4  ;;  %s659_s6 = int_to_ptr.vmem [resolvable:$true] %s658_s6  ;;  %s661_s7 = int_to_ptr.hbm [resolvable:$true] %s660_s7 }
  0x1f   : > { %365 = vmatpush.bf16.msra.mxu1 %v358_v18  ;;  %v403_v30 = vsel %vm356_vm3, %v396_v29, 0  ;;  %v515_v57 = vld [vmem:[#allocation2 + $0x60] sm:$0xf]  ;;  %v560_v5 = vld [vmem:[#allocation2 + $0x74] sm:$0xf]  ;;  %v849_v15 = vld [vmem:[#allocation2 + $0x6c] sm:$0xff] }
  0x20   : > { %410 = vmatpush.bf16.msra.mxu2 %v403_v30  ;;  %v448_v42 = vsel %vm356_vm3, %v441_v41, 0  ;;  %v486_v47 = vpack.c.b16 %v483_v46, %v483_v46  ;;  %v528_v58 = vunpack.c.l.b16 %v515_v57  ;;  %v908_v61 = vld [vmem:[%s1220_s4 + $0x2] ss:$0 sm:$0xff]  ;;  %v573_v6 = vunpack.c.l.b16 %v560_v5  ;;  %v848_v16 = vld [vmem:[#allocation2 + $0x64] sm:$0xff]  ;;  %v850_v28 = vld [vmem:[#allocation2 + $0x78] sm:$0xff]  ;;  %s646_s8 = scalar_lea.sflag [#allocation4], %s230_s13 }
  0x21   : > { %455 = vmatpush.bf16.msra.mxu3 %v448_v42  ;;  %v605_v17 = vld [vmem:[#allocation2 + $0x88] sm:$0xf]  ;;  %v851_v27 = vld [vmem:[#allocation2 + $0x80] sm:$0xff]  ;;  %s973_s9 = sshra.s32 %s661_s7, 4  ;;  %s979_s12 = scalar_lea.hbm %s1221_s5, 16  ;;  %s974_s9 = int_to_ptr.hbm [resolvable:$true] %s973_s9 }
  0x22   : > { %316 = vmatpush.bf16.msra.mxu0 %v837_v7  ;;  %v493_v48 = vsel %vm356_vm3, %v486_v47, 0  ;;  %v531_v59 = vpack.c.b16 %v528_v58, %v528_v58  ;;  %v576_v7 = vpack.c.b16 %v573_v6, %v573_v6  ;;  %v618_v18 = vunpack.c.l.b16 %v605_v17  ;;  %v911_v29 = vld [vmem:[%s1220_s4 + $0x5] ss:$0 sm:$0xff]  ;;  %s975_s22 = scalar_lea.hbm %s974_s9, 8  ;;  %p980_p3 = scmp.lt.s32.totalorder %s974_s9, %s1221_s5 }
  0x23   : > { %366 = vmatpush.bf16.msra.mxu1 %v839_v19  ;;  %p976_p0 = scmp.ne.s32.totalorder %s974_s9, %s975_s22  ;;  %p981_p4 = scmp.lt.s32.totalorder %s979_s12, %s975_s22 }
  0x24   : > { %411 = vmatpush.bf16.msra.mxu2 %v841_v31  ;;  %v538_v60 = vsel %vm356_vm3, %v531_v59, 0  ;;  %v621_v19 = vpack.c.b16 %v618_v18, %v618_v18 }
  0x25   : > { %456 = vmatpush.bf16.msra.mxu3 %v843_v43  ;;  %p977_p1 = pnand %p976_p0, %p1099_p5  ;;  %p982_p7 = por %p981_p4, %p980_p3 }
  0x26   : > { %317 = vmatpush.bf16.msra.mxu0 %v836_v8  ;;  %v583_v8 = vsel %vm356_vm3, %v576_v7, 0 }
  0x27   : > { %367 = vmatpush.bf16.msra.mxu1 %v838_v20  ;;  %v628_v20 = vsel %vm356_vm3, %v621_v19, 0  ;;  %p978_p2 = pneg %p977_p1 }
  0x28   : > { %412 = vmatpush.bf16.msra.mxu2 %v840_v32 }
  0x29   : > { %457 = vmatpush.bf16.msra.mxu3 %v842_v44  ;;  %p983_p8 = pnand %p982_p7, %p978_p2 }
  0x2a   : > { %318 = vmatpush.bf16.msra.mxu0 %v835_v9  ;;  %v909_v9 = vld [vmem:[%s1220_s4 + $0x3] ss:$0 sm:$0xff] }
  0x2b   : > { %500 = vmatpush.bf16.msrb.mxu1 %v493_v48 }
  0x2c   : > { %545 = vmatpush.bf16.msrb.mxu2 %v538_v60 }
  0x2d   : > { %590 = vmatpush.bf16.msrb.mxu3 %v583_v8 }
  0x2e   : > { %319 = vmatpush.bf16.msra.mxu0 %v834_v10 }
  0x2f   : > { %501 = vmatpush.bf16.msrb.mxu1 %v845_v55 }
  0x30   : > { %546 = vmatpush.bf16.msrb.mxu2 %v847_v3 }
  0x31   : > { %591 = vmatpush.bf16.msrb.mxu3 %v849_v15 }
  0x32   : > { %320 = vmatpush.bf16.msra.mxu0 %v833_v11 }
  0x33   : > { %502 = vmatpush.bf16.msrb.mxu1 %v844_v56 }
  0x34   : > { %547 = vmatpush.bf16.msrb.mxu2 %v846_v4 }
  0x35   : > { %592 = vmatpush.bf16.msrb.mxu3 %v848_v16 }
  0x36   : > { %321 = vmatpush.bf16.msra.mxu0 %v832_v12 }
  0x39   : > { %764 = vmatmul.msk.bf16.vlgmr.msra.gmra.mxu0 %vm303_vm2, %v239_v14 }
  0x3a   : > { %635 = vmatpush.bf16.msrb.mxu0 %v628_v20 }
  0x3e   : > { %636 = vmatpush.bf16.msrb.mxu0 %v851_v27 }
  0x42   : > { %637 = vmatpush.bf16.msrb.mxu0 %v850_v28 }
  0xb6   : > { %v323_v22 = vpop.f32.mrf.mxu0 }
  0xb7   : > { %v324_v23 = vadd.f32 %v905_v21, %v323_v22  ;;  %v910_v21 = vld [vmem:[%s1220_s4 + $0x4] ss:$0 sm:$0xff] }
  0xb9   : > { %913 = vtanh.f32 %v324_v23 }
  0xbe   : > { %v325_v24 = vpop.f32.mrf.mxu0 }
  0xbf   : > { %v914_v25 = vpop.eup %913 }
  0xc0   : > { %v328_v26 = vpack.c.bf16 %v914_v25, %v914_v25 }
  0xc2   : > { %773 = vmatmul.msk.bf16.vlgmr.msra.gmra.mxu1 %vm352_vm4, %v328_v26 }
 0x13f   : > { %v369_v34 = vpop.f32.mrf.mxu1 }
 0x140   : > { %v370_v35 = vadd.f32 %v906_v33, %v369_v34 }
 0x142   : > { %915 = vtanh.f32 %v370_v35  ;;  %v912_v35 = vld [vmem:[%s1220_s4 + $0x6] ss:$0 sm:$0xff] }
 0x147   : > { %v371_v36 = vpop.f32.mrf.mxu1 }
 0x148   : > { %v916_v37 = vpop.eup %915 }
 0x149   : > { %v374_v38 = vpack.c.bf16 %v916_v37, %v916_v37 }
 0x14b   : > { %782 = vmatmul.msk.bf16.vlgmr.msra.gmra.mxu2 %vm352_vm4, %v374_v38 }
 0x1ce   : > { %v414_v50 = vpop.f32.mrf.mxu2 }
 0x1cf   : > { %v415_v51 = vadd.f32 %v907_v49, %v414_v50 }
 0x1d1   : > { %917 = vtanh.f32 %v415_v51 }
 0x1d6   : > { %v416_v52 = vpop.f32.mrf.mxu2 }
 0x1d7   : > { %v918_v53 = vpop.eup %917 }
 0x1d8   : > { %v419_v54 = vpack.c.bf16 %v918_v53, %v918_v53 }
 0x1da   : > { %791 = vmatmul.msk.bf16.vlgmr.msra.gmra.mxu3 %vm352_vm4, %v419_v54 }
 0x25d   : > { %v459_v62 = vpop.f32.mrf.mxu3 }
 0x25e   : > { %v460_v63 = vadd.f32 %v908_v61, %v459_v62 }
 0x260   : > { %919 = vtanh.f32 %v460_v63 }
 0x265   : > { %v461_v0 = vpop.f32.mrf.mxu3 }
 0x266   : > { %v920_v1 = vpop.eup %919 }
 0x267   : > { %v464_v2 = vpack.c.bf16 %v920_v1, %v920_v1 }
 0x269   : > { %800 = vmatmul.msk.bf16.vlgmr.msrb.gmra.mxu1 %vm352_vm4, %v464_v2 }
 0x2e6   : > { %v504_v10 = vpop.f32.mrf.mxu1 }
 0x2e7   : > { %v505_v11 = vadd.f32 %v909_v9, %v504_v10 }
 0x2e9   : > { %921 = vtanh.f32 %v505_v11 }
 0x2ee   : > { %v506_v12 = vpop.f32.mrf.mxu1 }
 0x2ef   : > { %v922_v13 = vpop.eup %921 }
 0x2f0   : > { %v509_v14 = vpack.c.bf16 %v922_v13, %v922_v13 }
 0x2f2   : > { %809 = vmatmul.msk.bf16.vlgmr.msrb.gmra.mxu2 %vm352_vm4, %v509_v14 }
 0x375   : > { %v549_v22 = vpop.f32.mrf.mxu2 }
 0x376   : > { %v550_v23 = vadd.f32 %v910_v21, %v549_v22 }
 0x378   : > { %923 = vtanh.f32 %v550_v23 }
 0x37d   : > { %v551_v24 = vpop.f32.mrf.mxu2 }
 0x37e   : > { %v924_v25 = vpop.eup %923 }
 0x37f   : > { %v554_v26 = vpack.c.bf16 %v924_v25, %v924_v25 }
 0x381   : > { %818 = vmatmul.msk.bf16.vlgmr.msrb.gmra.mxu3 %vm352_vm4, %v554_v26 }
 0x404   : > { %v594_v30 = vpop.f32.mrf.mxu3 }
 0x405   : > { %v595_v31 = vadd.f32 %v911_v29, %v594_v30 }
 0x407   : > { %925 = vtanh.f32 %v595_v31 }
 0x40c   : > { %v596_v32 = vpop.f32.mrf.mxu3 }
 0x40d   : > { %v926_v33 = vpop.eup %925 }
 0x40e   : > { %v599_v34 = vpack.c.bf16 %v926_v33, %v926_v33 }
 0x410   : > { %827 = vmatmul.msk.bf16.vlgmr.msrb.gmra.mxu0 %vm352_vm4, %v599_v34 }
 0x48d   : > { %v639_v36 = vpop.f32.mrf.mxu0 }
 0x48e   : > { %v640_v37 = vadd.f32 %v912_v35, %v639_v36 }
 0x490   : > { %927 = vtanh.f32 %v640_v37 }
 0x495   : > { %v641_v38 = vpop.f32.mrf.mxu0 }
 0x496   : > { %v928_v39 = vpop.eup %927 }
 0x497   : > { %644 = vst.msk [vmem:[%s232_s30] sm:$0xff] %vm352_vm4, %v928_v39 }
 0x498   : > { %986 = shalt.err (!%p983_p8)
}
 0x499   : > { %856 = dma.vmem_to_hbm [thread:$0]  (%p1099_p5), %s659_s6, 128, %s661_s7, %s646_s8  }
 0x49a PF: > { %p868_p9 = scmp.ge.s32.totalorder %s1025_s21, 2  ;;  %s672_s13 = sand.u32 1, %s1013_s18  }
 0x49b   : > { %s673_s16 = scalar_lea.sflag [#allocation4], %s672_s13 }
 0x49c   : > { %p863_p10 = pnand %p868_p9, %p1103_p6 }
 0x49e   : > { %p864_p11 = pneg %p863_p10 }
 0x4a0   : > { %1008 = dma.done.wait (%p864_p11), %s673_s16, 128  }
 0x4a1   : > { %1010 = vsyncadd (%p864_p11), %s673_s16, 4294967168  ;;  %p16_p12 = scmp.ge.s32.totalorder %s1086_s24, 4   ;;  %s1224_s18 = smov %s1017_s19 }
 0x4a2   : > { %s1225_s19 = smov %s1021_s20  ;;  %s1226_s20 = smov %s1097_s27 }
 0x4a3   : > { %s1227_s21 = smov %s1086_s24  ;;  %18 = sbr.rel (!%p16_p12) target bundleno = 4 (0x4), region = 86 }
 0x4a8   :  { %679 = vsyncpa [#allocation3], 1 }
 0x4a9   :  { %681 = vsyncpa [#allocation3 + $0x1], 1 }
 0x4aa   :  { %682 = vsyncpa [#allocation4], 1 }
 0x4ab   :  { %684 = vsyncpa [#allocation4 + $0x1], 1 }

</bundles_post_ra>
